<compile_context>
chip_gen: v6e
topology: v6e:2x2x1
jax: 0.10.0
libtpu: 0.0.40
codegen_flags: <defaults>
</compile_context>

<pallas_src>
import jax
import jax.numpy as jnp
from jax.experimental import pallas as pl
from jax.experimental.pallas import tpu as pltpu


# -----------------------------------------------------------------------------
# Kernel 1: g = sigmoid((market_info @ W1 + b1) @ W2 + b2)   -> (B, d_model)
# Tiny (KB-scale) problem: single block, runs once, off the critical path.
# -----------------------------------------------------------------------------
def _gate_kernel(mi_ref, w1_ref, b1_ref, w2_ref, b2_ref, g_ref):
    mf = jnp.dot(mi_ref[...], w1_ref[...],
                 preferred_element_type=jnp.float32) + b1_ref[...]
    g_ref[...] = jax.nn.sigmoid(
        jnp.dot(mf, w2_ref[...], preferred_element_type=jnp.float32) + b2_ref[...]
    )


# -----------------------------------------------------------------------------
# Kernel 2: out = x * gate   (memory-bound broadcast multiply)
# x / out blocks are (TB, TS*d_model) lane-dense slabs; gw arrives pre-tiled to
# the same lane width, so the body is a single dense VPU multiply + vst.
# -----------------------------------------------------------------------------
def _apply_gate_kernel(x_ref, gw_ref, o_ref):
    o_ref[...] = (x_ref[...] * gw_ref[...]).astype(o_ref.dtype)


def _pick_batch_tile(B: int) -> int:
    # Sublane dim of the 2-D block: must be a multiple of 8 or the full B.
    if B <= 8 or B % 8 != 0:
        return B
    return 8


def _pick_seq_tile(S: int, d_model: int, tb: int, itemsize: int,
                   budget_bytes: int) -> int:
    # Lane dim of the block is ts*d_model: must be a multiple of 128 (or the
    # full S*d_model).  Pick the biggest divisor of S that fits the byte budget.
    target = max(1, budget_bytes // (tb * d_model * itemsize))
    for ts in range(min(S, target), 0, -1):
        if S % ts == 0 and (ts * d_model) % 128 == 0:
            return ts
    return S  # single lane-block covering the whole flattened row (always legal)


def market_gating(x, market_info, w1, b1, w2, b2):
    B, S, d_model = x.shape
    d_feat = market_info.shape[-1]
    itemsize = jnp.dtype(x.dtype).itemsize

    full = lambda shape: pl.BlockSpec(shape, lambda: (0,) * len(shape))

    # ---- 1) gates (B, d_model), computed once ------------------------------
    g = pl.pallas_call(
        _gate_kernel,
        out_shape=jax.ShapeDtypeStruct((B, d_model), jnp.float32),
        grid=(),
        in_specs=[
            full((B, d_feat)),          # market_info
            full((d_feat, d_model)),    # W1 (torch weight .T)
            full((1, d_model)),         # b1
            full((d_model, d_model)),   # W2 (torch weight .T)
            full((1, d_model)),         # b2
        ],
        out_specs=full((B, d_model)),
        cost_estimate=pl.CostEstimate(
            flops=2 * B * d_model * (d_feat + d_model),
            transcendentals=B * d_model,
            bytes_accessed=(B * d_feat + d_feat * d_model + d_model * d_model
                            + 2 * d_model + B * d_model) * 4,
        ),
    )(market_info, w1, b1, w2, b2)

    # ---- 2) tile sizes (per-generation safe: ~4 MiB blocks, 32 MiB VMEM cap) -
    tb = _pick_batch_tile(B)
    ts = _pick_seq_tile(S, d_model, tb, itemsize, budget_bytes=4 * 1024 * 1024)
    lane_w = ts * d_model

    # ---- 3) lane-dense layout + gate expanded to one block's lane width -----
    x2 = x.reshape(B, S * d_model)
    gw = jnp.tile(g.astype(x.dtype), (1, ts))          # (B, ts*d_model), tiny

    out2 = pl.pallas_call(
        _apply_gate_kernel,
        out_shape=jax.ShapeDtypeStruct((B, S * d_model), x.dtype),
        grid=(B // tb, S // ts),
        in_specs=[
            pl.BlockSpec((tb, lane_w), lambda b, s: (b, s)),   # x tile (streamed)
            pl.BlockSpec((tb, lane_w), lambda b, s: (b, 0)),   # gate (resident per b-tile)
        ],
        out_specs=pl.BlockSpec((tb, lane_w), lambda b, s: (b, s)),
        compiler_params=pltpu.CompilerParams(
            dimension_semantics=("parallel", "parallel"),
            vmem_limit_bytes=32 * 1024 * 1024,
        ),
        cost_estimate=pl.CostEstimate(
            flops=B * S * d_model,
            transcendentals=0,
            bytes_accessed=(2 * B * S * d_model + B * lane_w) * itemsize,
        ),
    )(x2, gw)

    return out2.reshape(B, S, d_model)


if __name__ == "__main__":
    B, S, d_feat, d_model = 2, 8, 16, 32

    key = jax.random.PRNGKey(0)
    kx, km, k1, k2, k3, k4 = jax.random.split(key, 6)

    x = jax.random.normal(kx, (B, S, d_model), dtype=jnp.float32)
    market_info = jax.random.normal(km, (B, d_feat), dtype=jnp.float32)

    # Params match nn.Linear(d_feat, d_model) / nn.Linear(d_model, d_model),
    # stored as (in, out) i.e. torch weight .T
    w1 = jax.random.normal(k1, (d_feat, d_model), dtype=jnp.float32) * (1.0 / d_feat ** 0.5)
    b1 = jax.random.normal(k2, (1, d_model), dtype=jnp.float32) * 0.01
    w2 = jax.random.normal(k3, (d_model, d_model), dtype=jnp.float32) * (1.0 / d_model ** 0.5)
    b2 = jax.random.normal(k4, (1, d_model), dtype=jnp.float32) * 0.01

    fn = jax.jit(market_gating)
    out = fn(x, market_info, w1, b1, w2, b2)
    jax.block_until_ready(out)

    # Pure-JAX reference check
    mf_ref = market_info @ w1 + b1
    g_ref = jax.nn.sigmoid(mf_ref @ w2 + b2)
    ref = x * g_ref[:, None, :]
    assert jnp.allclose(out, ref, atol=1e-5, rtol=1e-5), "mismatch vs reference"

    print("KERNEL_OK")
</pallas_src>

<mosaic_0001>
module attributes {stable_mosaic.version = 11 : i64} {
  func.func @_gate_kernel(%arg0: memref<2x16xf32, #tpu.memory_space<vmem>>, %arg1: memref<16x32xf32, #tpu.memory_space<vmem>>, %arg2: memref<1x32xf32, #tpu.memory_space<vmem>>, %arg3: memref<32x32xf32, #tpu.memory_space<vmem>>, %arg4: memref<1x32xf32, #tpu.memory_space<vmem>>, %arg5: memref<2x32xf32, #tpu.memory_space<vmem>>) attributes {dimension_semantics = [], scalar_prefetch = 0 : i64, scratch_operands = 0 : i64, tpu.core_type = #tpu.core_type<tc>} {
    %c0 = arith.constant 0 : index
    %c0_0 = arith.constant 0 : index
    %0 = vector.load %arg0[%c0, %c0_0] : memref<2x16xf32, #tpu.memory_space<vmem>>, vector<2x16xf32>
    %c0_1 = arith.constant 0 : index
    %c0_2 = arith.constant 0 : index
    %1 = vector.load %arg1[%c0_1, %c0_2] : memref<16x32xf32, #tpu.memory_space<vmem>>, vector<16x32xf32>
    %cst = arith.constant dense<0.000000e+00> : vector<2x32xf32>
    %2 = tpu.matmul %0, %1, %cst {dimension_numbers = #tpu.dot_dimension_numbers<[1], [0], [0], [1], [0, 0, 1, 1], [], []>} : vector<2x16xf32>, vector<16x32xf32>, vector<2x32xf32> -> vector<2x32xf32>
    %c0_3 = arith.constant 0 : index
    %c0_4 = arith.constant 0 : index
    %3 = vector.load %arg2[%c0_3, %c0_4] : memref<1x32xf32, #tpu.memory_space<vmem>>, vector<1x32xf32>
    %4 = vector.broadcast %3 : vector<1x32xf32> to vector<2x32xf32>
    %5 = arith.addf %2, %4 : vector<2x32xf32>
    %c0_5 = arith.constant 0 : index
    %c0_6 = arith.constant 0 : index
    %6 = vector.load %arg3[%c0_5, %c0_6] : memref<32x32xf32, #tpu.memory_space<vmem>>, vector<32x32xf32>
    %cst_7 = arith.constant dense<0.000000e+00> : vector<2x32xf32>
    %7 = tpu.matmul %5, %6, %cst_7 {dimension_numbers = #tpu.dot_dimension_numbers<[1], [0], [0], [1], [0, 0, 1, 1], [], []>} : vector<2x32xf32>, vector<32x32xf32>, vector<2x32xf32> -> vector<2x32xf32>
    %c0_8 = arith.constant 0 : index
    %c0_9 = arith.constant 0 : index
    %8 = vector.load %arg4[%c0_8, %c0_9] : memref<1x32xf32, #tpu.memory_space<vmem>>, vector<1x32xf32>
    %9 = vector.broadcast %8 : vector<1x32xf32> to vector<2x32xf32>
    %10 = arith.addf %7, %9 : vector<2x32xf32>
    %11 = arith.negf %10 : vector<2x32xf32>
    %12 = math.exp %11 : vector<2x32xf32>
    %cst_10 = arith.constant 1.000000e+00 : f32
    %13 = vector.broadcast %cst_10 : f32 to vector<2x32xf32>
    %14 = arith.addf %13, %12 : vector<2x32xf32>
    %15 = arith.divf %13, %14 : vector<2x32xf32>
    %c0_11 = arith.constant 0 : index
    %c0_12 = arith.constant 0 : index
    %16 = vector.load %arg5[%c0_11, %c0_12] : memref<2x32xf32, #tpu.memory_space<vmem>>, vector<2x32xf32>
    tpu.vector_store %arg5[%c0_11, %c0_12], %15 {strides = array<i32>} : memref<2x32xf32, #tpu.memory_space<vmem>>, vector<2x32xf32>,
    return
  }
}

module attributes {stable_mosaic.version = 11 : i64} {
  func.func @_apply_gate_kernel(%arg0: i32, %arg1: i32, %arg2: memref<2x256xf32, #tpu.memory_space<vmem>>, %arg3: memref<2x256xf32, #tpu.memory_space<vmem>>, %arg4: memref<2x256xf32, #tpu.memory_space<vmem>>) attributes {dimension_semantics = [#tpu.dimension_semantics<parallel>, #tpu.dimension_semantics<parallel>], iteration_bounds = array<i64: 1, 1>, scalar_prefetch = 0 : i64, scratch_operands = 0 : i64, tpu.core_type = #tpu.core_type<tc>, window_params = [{transform_indices = @transform_0, window_bounds = array<i64: 2, 256>}, {transform_indices = @transform_1, window_bounds = array<i64: 2, 256>}, {transform_indices = @transform_2, window_bounds = array<i64: 2, 256>}]} {
    %c0 = arith.constant 0 : index
    %c0_0 = arith.constant 0 : index
    %0 = vector.load %arg2[%c0, %c0_0] : memref<2x256xf32, #tpu.memory_space<vmem>>, vector<2x256xf32>
    %c0_1 = arith.constant 0 : index
    %c0_2 = arith.constant 0 : index
    %1 = vector.load %arg3[%c0_1, %c0_2] : memref<2x256xf32, #tpu.memory_space<vmem>>, vector<2x256xf32>
    %2 = arith.mulf %0, %1 : vector<2x256xf32>
    %c0_3 = arith.constant 0 : index
    %c0_4 = arith.constant 0 : index
    %3 = vector.load %arg4[%c0_3, %c0_4] : memref<2x256xf32, #tpu.memory_space<vmem>>, vector<2x256xf32>
    tpu.vector_store %arg4[%c0_3, %c0_4], %2 {strides = array<i32>} : memref<2x256xf32, #tpu.memory_space<vmem>>, vector<2x256xf32>,
    return
  }
  func.func @transform_0(%arg0: i32, %arg1: i32) -> (i32, i32) {
    %c0_i32 = arith.constant 0 : i32
    return %arg0, %arg1 : i32, i32
  }
  func.func @transform_1(%arg0: i32, %arg1: i32) -> (i32, i32) {
    %c0_i32 = arith.constant 0 : i32
    %c0_i32_0 = arith.constant 0 : i32
    return %arg0, %c0_i32 : i32, i32
  }
  func.func @transform_2(%arg0: i32, %arg1: i32) -> (i32, i32) {
    %c0_i32 = arith.constant 0 : i32
    return %arg0, %arg1 : i32, i32
  }
}

</mosaic_0001>

<bundles_post_ra>
// kernel: tile.9
= control target key start
LH: loop header
LB: loop body
LE: loop exit
PB: predicated region body
PF: predicated region fallthrough
CT: control target
= control target key end

     0   :  { %s52_s8 = smov 96   ;;  %vm3_vm0 = vcmask 261120   ;;  %s54_s15 = smov 64   ;;  %vm11_vm1 = vcmask 1048320   ;;  %vm19_vm2 = vcmask 785920   ;;  %vm27_vm3 = vcmask 523520   ;;  %s83_s0 = inlined_call_operand.vmem [shape: f32[2,8,32], index: 0, kind: input, shape index: {}]   ;;  %s84_s1 = inlined_call_operand.vmem [shape: f32[2,256], index: 1, kind: output, shape index: {}]  }
   0x1   :  { %v45_v0 = vld.sshfl [vmem:[%s83_s0 + $0x3] sm:$0xff pattern:$0xccccc480]   ;;  %v46_v1 = vld.sshfl [vmem:[%s83_s0 + $0x2] sm:$0xff pattern:$0xccccc480]  }
   0x2   :  { %9 = vrot.lane.b32.xlu0 %v45_v0, %s52_s8  ;;  %v47_v2 = vld.sshfl [vmem:[%s83_s0 + $0x1] sm:$0xff pattern:$0xccccc480]   ;;  %v2_v3 = vld [vmem:[%s83_s0] ss:$4 sm:$0xf]  }
   0x3   :  { %s53_s0 = smov 32   ;;  %4 = vst.msk [vmem:[#allocation0] ss:$8 sm:$0x3] %vm3_vm0, %v2_v3  }
   0x4   :  { %25 = vrot.lane.b32.xlu1 %v47_v2, %s53_s0  ;;  %6 = vst.msk [vmem:[#allocation0 - $0xf] ss:$8 sm:$0xc] %vm3_vm0, %v2_v3  }
   0x6   :  { %17 = vrot.lane.b32.xlu0 %v46_v1, %s54_s15 }
  0x74   :  { %v10_v4 = vpop.permute.xlu0 %9  }
  0x75   :  { %12 = vst.msk [vmem:[#allocation0] sm:$0x3] %vm11_vm1, %v10_v4   ;;  %14 = vst.msk [vmem:[#allocation0 + $0x6] sm:$0xc] %vm11_vm1, %v10_v4  }
  0x76   :  { %v26_v5 = vpop.permute.xlu1 %25  }
  0x78   :  { %v18_v6 = vpop.permute.xlu0 %17  }
  0x79   :  { %20 = vst.msk [vmem:[#allocation0] sm:$0x3] %vm19_vm2, %v18_v6   ;;  %22 = vst.msk [vmem:[#allocation0 + $0x6] sm:$0xc] %vm19_vm2, %v18_v6  }
  0x7a   :  { %28 = vst.msk [vmem:[#allocation0] sm:$0x3] %vm27_vm3, %v26_v5   ;;  %30 = vst.msk [vmem:[#allocation0 + $0x6] sm:$0xc] %vm27_vm3, %v26_v5  }
  0x81   :  { %v35_v7 = vld [vmem:[#allocation0] sm:$0x3]  ;;  %v40_v8 = vld [vmem:[#allocation0 + $0x8] sm:$0x3] }
  0x82   :  { %38 = vst [vmem:[%s84_s1] sm:$0x3] %v35_v7  ;;  %48 = vst [vmem:[%s84_s1 + $0x2] sm:$0x3] %v40_v8 }

// kernel: market_gating.2
= control target key start
LH: loop header
LB: loop body
LE: loop exit
PB: predicated region body
PF: predicated region fallthrough
CT: control target
= control target key end

     0   :  { %10 = vsyncpa [#allocation3], 0  ;;  %s370_s0 = inlined_call_operand.vmem [shape: f32[2,16], index: 0, kind: input, shape index: {}]   ;;  %s371_s1 = inlined_call_operand.hbm [shape: f32[16,32], index: 1, kind: input, shape index: {}]   ;;  %s372_s2 = inlined_call_operand.vmem [shape: f32[1,32], index: 2, kind: input, shape index: {}]   ;;  %s373_s3 = inlined_call_operand.hbm [shape: f32[32,32], index: 3, kind: input, shape index: {}]   ;;  %s374_s4 = inlined_call_operand.vmem [shape: f32[1,32], index: 4, kind: input, shape index: {}]   ;;  %s375_s5 = inlined_call_operand.vmem [shape: f32[2,32], index: 5, kind: output, shape index: {}]  }
   0x1   :  { %11 = vsyncpa [#allocation5], 0  ;;  %s316_s18 = smov [#allocation2]  }
   0x2   :  { %s19_s19 = sshll.u32 %s316_s18, 4  ;;  %s20_s19 = int_to_ptr.vmem [resolvable:$true] %s19_s19 }
   0x3   :  { %s280_s20 = scalar_lea.vmem %s20_s19, 256  ;;  %p285_p1 = scmp.lt.s32.totalorder %s20_s19, %s20_s19 }
   0x4   :  { %p281_p0 = scmp.ne.s32.totalorder %s20_s19, %s280_s20  ;;  %p286_p2 = scmp.lt.s32.totalorder %s280_s20, %s280_s20 }
   0x6   :  { %p287_p3 = por %p286_p2, %p285_p1 }
   0x8   :  { %p288_p4 = pnand %p287_p3, %p281_p0 }
   0xa   :  { %291 = shalt.err (!%p288_p4)
}
   0xb   :  { %s317_s21 = smov 128   ;;  %s318_s22 = smov 8  }
   0xc   :  { %25 = dma.hbm_to_vmem [thread:$0]  %s371_s1, 256, %s20_s19, [#allocation3], %s317_s21, %s317_s21, %s318_s22  }
   0xd   :  { %s319_s25 = smov [#allocation4]  }
   0xe   :  { %s33_s26 = sshll.u32 %s319_s25, 4  ;;  %s34_s26 = int_to_ptr.vmem [resolvable:$true] %s33_s26 }
   0xf   :  { %s300_s27 = scalar_lea.vmem %s34_s26, 512  ;;  %p305_p6 = scmp.lt.s32.totalorder %s34_s26, %s34_s26 }
  0x10   :  { %p301_p5 = scmp.ne.s32.totalorder %s34_s26, %s300_s27  ;;  %p306_p7 = scmp.lt.s32.totalorder %s300_s27, %s300_s27 }
  0x12   :  { %p307_p8 = por %p306_p7, %p305_p6 }
  0x14   :  { %p308_p9 = pnand %p307_p8, %p301_p5 }
  0x16   :  { %311 = shalt.err (!%p308_p9)
}
  0x17   :  { %39 = dma.hbm_to_vmem [thread:$0]  %s373_s3, 512, %s34_s26, [#allocation5], %s317_s21, %s317_s21, %s318_s22  }
  0x18   :  { %312 = dma.done.wait [#allocation3], 256  }
  0x19   :  { %313 = vsyncadd [#allocation3], 4294967040 }
  0x1a   :  { %314 = dma.done.wait [#allocation5], 512  }
  0x1b   :  { %315 = vsyncadd [#allocation5], 4294966784  ;;  %v320_v0 = vmov 0.0   ;;  %vm321_vm0 = vmmov 0   ;;  %v50_v1 = vld [vmem:[#allocation2 + $0x8] sm:$0xff]  ;;  %v49_v2 = vld [vmem:[#allocation2] sm:$0xff] }
  0x1c   :  { %244 = vmatprep.subr.mxu0 %v320_v0  ;;  %248 = vmatprep.mubr.msk.f32.mxu0 %vm321_vm0, %v320_v0  ;;  %v48_v3 = vld [vmem:[%s370_s0] sm:$0x3]  ;;  %vm58_vm1 = vcmask 130048   ;;  %v135_v4 = vld [vmem:[#allocation4 + $0x18] sm:$0xff]  ;;  %v133_v6 = vld [vmem:[#allocation4 + $0x8] sm:$0xff]  ;;  %vm143_vm2 = vcmask 261120  }
  0x1d   :  { %251 = vmatprep.subr.mxu1 %v320_v0  ;;  %259 = vmatprep.mubr.msk.f32.mxu1 %vm321_vm0, %v320_v0  ;;  %v134_v5 = vld [vmem:[#allocation4 + $0x10] sm:$0xff]  ;;  %v132_v7 = vld [vmem:[#allocation4] sm:$0xff]  ;;  %vm223_vm3 = vcmask 254976  }
  0x1e   :  { %245 = vmatpush3.msra.mxu0 %v50_v1  ;;  %252 = vmatpush3.msra.mxu1 %v135_v4  ;;  %v231_v8 = vld [vmem:[%s372_s2] ss:$0 sm:$0xff] }
  0x1f   :  { %246 = vmatprep.subr.mxu0 %v320_v0  ;;  %253 = vmatprep.subr.mxu1 %v320_v0  ;;  %v233_v12 = vld [vmem:[%s374_s4] ss:$0 sm:$0xff] }
  0x20   :  { %247 = vmatpush3.msra.mxu0 %v49_v2  ;;  %254 = vmatpush3.msra.mxu1 %v134_v5 }
  0x21   :  { %249 = vmatmul.mubr.msk.f32.vlgmr.msra.gmra.mxu0 %vm58_vm1, %v48_v3  ;;  %255 = vmatprep.subr.mxu1 %v320_v0 }
  0x22   :  { %256 = vmatpush3.msra.mxu1 %v133_v6 }
  0x23   :  { %257 = vmatprep.subr.mxu1 %v320_v0 }
  0x24   :  { %258 = vmatpush3.msra.mxu1 %v132_v7 }
  0xe1   :  { %v128_v9 = vpop.f32.mrf.mxu0 }
  0xe2   :  { %v129_v10 = vadd.f32 %v231_v8, %v128_v9 }
  0xe3   :  { %v250_v11 = vpop.f32.mrf.mxu0 }
  0xe4   :  { %260 = vmatmul.mubr.msk.f32.vlgmr.msra.gmra.mxu1 %vm143_vm2, %v129_v10 }
 0x1a4   :  { %v213_v13 = vpop.f32.mrf.mxu1 }
 0x1a5   :  { %v214_v14 = vadd.f32 %v233_v12, %v213_v13 }
 0x1a6   :  { %v261_v15 = vpop.f32.mrf.mxu1 }
 0x1a7   :  { %v235_v16 = vmul.f32 -1.442695, %v214_v14 }
 0x1a9   :  { %268 = vpow2.f32 %v235_v16 }
 0x1b6   :  { %v269_v17 = vpop.eup %268 }
 0x1b7   :  { %v220_v18 = vadd.f32 1.0, %v269_v17 }
 0x1b9   :  { %270 = vrcp.f32 %v220_v18 }
 0x1c6   :  { %v271_v19 = vpop.eup %270 }
 0x1c7   :  { %224 = vst.msk [vmem:[%s375_s5] sm:$0x3] %vm223_vm3, %v271_v19 }
 0x1c8   :  { %229 = vsyncpa [#allocation3], 1 }
 0x1c9   :  { %230 = vsyncpa [#allocation5], 1 }

// kernel: market_gating.3
= control target key start
LH: loop header
LB: loop body
LE: loop exit
PB: predicated region body
PF: predicated region fallthrough
CT: control target
= control target key end

     0   :  { %s43_s0 = inlined_call_operand.vmem [shape: f32[2,256], index: 0, kind: input, shape index: {}]   ;;  %s44_s1 = inlined_call_operand.vmem [shape: f32[2,256], index: 1, kind: input, shape index: {}]   ;;  %s45_s2 = inlined_call_operand.vmem [shape: f32[2,256], index: 2, kind: output, shape index: {}]  }
   0x1   :  { %v11_v0 = vld [vmem:[%s43_s0] sm:$0xf] }
   0x2   :  { %v12_v1 = vld [vmem:[%s44_s1] sm:$0xf] }
   0x3   :  { %v13_v2 = vmul.f32 %v12_v1, %v11_v0 }
   0x5   :  { %14 = vst [vmem:[%s45_s2] sm:$0xf] %v13_v2 }

</bundles_post_ra>
